<compile_context>
chip_gen: v7x
topology: tpu7x:2x2x1
jax: 0.10.0
libtpu: 0.0.40
codegen_flags: <defaults>
</compile_context>

<pallas_src>
import math

import jax
import jax.numpy as jnp
from jax.experimental import pallas as pl
from jax.experimental.pallas import tpu as pltpu

IMG_SIZE = 28
NUM_CLASSES = 10
IN_FEATURES = IMG_SIZE * IMG_SIZE   # 784
N_PAD = 128                         # class dim padded to one full lane tile
DEFAULT_TILE_B = 1024               # ~6.1 MiB double-buffered f32 x block


def _round_up(x, m):
    return (x + m - 1) // m * m


def _choose_tile_b(B):
    """Static batch-tile choice (B is a trace-time Python int)."""
    if B <= 8:
        return 8
    # Aim for >= 2 grid steps so both v7x TensorCores get work; cap at
    # DEFAULT_TILE_B (roofline sweet spot, comfortably inside scoped VMEM).
    half = _round_up(pl.cdiv(B, 2), 8)
    return min(DEFAULT_TILE_B, half)


def _fc1_kernel(x_ref, wt_ref, b_ref, o_ref):
    # x_ref:  (tile_b, 784)  f32  VMEM  (one batch tile per grid step)
    # wt_ref: (784, 128)     bf16 VMEM  (resident: constant block index)
    # b_ref:  (1, 128)       f32  VMEM  (resident)
    # o_ref:  (tile_b, 128)  f32  VMEM  (lane-dense -> unmasked stores)
    x_bf16 = x_ref[...].astype(jnp.bfloat16)          # VPU cast, hidden under DMA
    o_ref[...] = (
        jnp.dot(x_bf16, wt_ref[...], preferred_element_type=jnp.float32)
        + b_ref[...]
    )


def prepare_params(weight, bias, compute_dtype=jnp.bfloat16):
    """One-time parameter prep (do NOT call per forward step).

    weight: (10, 784) float32 (PyTorch nn.Linear layout) -> (784, 128) compute_dtype
    bias:   (10,)     float32                            -> (1, 128)   float32
    Padding is zeros, so the padded class columns contribute nothing.
    """
    wt_pad = jnp.zeros((IN_FEATURES, N_PAD), compute_dtype)
    wt_pad = wt_pad.at[:, :NUM_CLASSES].set(
        jnp.asarray(weight).T.astype(compute_dtype)
    )
    b_pad = jnp.zeros((1, N_PAD), jnp.float32)
    b_pad = b_pad.at[0, :NUM_CLASSES].set(jnp.asarray(bias).astype(jnp.float32))
    return wt_pad, b_pad


@jax.jit
def network_forward(x_nchw, wt_pad, b_pad):
    """Pallas equivalent of Network.forward.

    x_nchw : (..., 28, 28) float32 (e.g. (B, 1, 28, 28) NCHW MNIST batch)
    wt_pad : (784, 128)    bf16  (from prepare_params)
    b_pad  : (1, 128)      f32   (from prepare_params)
    returns: (B, 10)       f32 logits
    """
    # Exactly input.view(-1, 784); no dtype cast, no padding -> single HBM pass.
    x = x_nchw.reshape(-1, IN_FEATURES)
    B = x.shape[0]
    if B == 0:
        return jnp.zeros((0, NUM_CLASSES), jnp.float32)

    tile_b = _choose_tile_b(B)
    grid = (pl.cdiv(B, tile_b),)

    out_padded = pl.pallas_call(
        _fc1_kernel,
        out_shape=jax.ShapeDtypeStruct((B, N_PAD), jnp.float32),
        grid=grid,
        in_specs=[
            pl.BlockSpec((tile_b, IN_FEATURES), lambda i: (i, 0)),  # x: batch-tiled
            pl.BlockSpec((IN_FEATURES, N_PAD), lambda i: (0, 0)),   # W^T: resident
            pl.BlockSpec((1, N_PAD), lambda i: (0, 0)),             # bias: resident
        ],
        out_specs=pl.BlockSpec((tile_b, N_PAD), lambda i: (i, 0)),
        compiler_params=pltpu.CompilerParams(
            dimension_semantics=("parallel",),                      # megacore on v7x
        ),
    )(x, wt_pad, b_pad)

    # Strip the class-dim lane padding (partial-batch OOB rows never exist in
    # the (B, N_PAD) output; Pallas clips the last block's writeback).
    return out_padded[:, :NUM_CLASSES]


def init_params(key):
    """Deterministic init mimicking torch.nn.Linear(784, 10) default init."""
    kw, kb = jax.random.split(key)
    bound = 1.0 / math.sqrt(IN_FEATURES)
    weight = jax.random.uniform(
        kw, (NUM_CLASSES, IN_FEATURES), jnp.float32, minval=-bound, maxval=bound
    )
    bias = jax.random.uniform(
        kb, (NUM_CLASSES,), jnp.float32, minval=-bound, maxval=bound
    )
    return weight, bias


if __name__ == "__main__":
    key = jax.random.PRNGKey(0)
    k_x, k_p = jax.random.split(key)

    B = 8
    # Synthetic "MNIST-normalized" batch, NCHW like the PyTorch dataloader.
    x = jax.random.normal(k_x, (B, 1, IMG_SIZE, IMG_SIZE), jnp.float32)

    weight, bias = init_params(k_p)
    wt_pad, b_pad = prepare_params(weight, bias)      # one-time prep

    out = network_forward(x, wt_pad, b_pad)
    out = jax.block_until_ready(out)
    assert out.shape == (B, NUM_CLASSES)

    x2d = x.reshape(B, IN_FEATURES)
    # Reference in the exact kernel dtypes (bf16 operands, f32 accumulation).
    ref_bf16 = (
        x2d.astype(jnp.bfloat16).astype(jnp.float32)
        @ weight.T.astype(jnp.bfloat16).astype(jnp.float32)
        + bias
    )
    # Full-precision f32 reference (the PyTorch module semantics).
    ref_f32 = x2d @ weight.T + bias

    assert jnp.allclose(out, ref_bf16, atol=2e-3, rtol=2e-3)
    assert jnp.allclose(out, ref_f32, atol=5e-2, rtol=0.0)

    print("KERNEL_OK")
</pallas_src>

<mosaic_0001>
module attributes {stable_mosaic.version = 11 : i64} {
  func.func @_fc1_kernel(%arg0: i32, %arg1: memref<8x784xf32, #tpu.memory_space<vmem>>, %arg2: memref<784x128xbf16, #tpu.memory_space<vmem>>, %arg3: memref<1x128xf32, #tpu.memory_space<vmem>>, %arg4: memref<8x128xf32, #tpu.memory_space<vmem>>) attributes {dimension_semantics = [#tpu.dimension_semantics<parallel>], iteration_bounds = array<i64: 1>, scalar_prefetch = 0 : i64, scratch_operands = 0 : i64, tpu.core_type = #tpu.core_type<tc>, window_params = [{transform_indices = @transform_0, window_bounds = array<i64: 8, 784>}, {pipeline_mode = #tpu.pipeline_mode<synchronous>, transform_indices = @transform_1, window_bounds = array<i64: 784, 128>}, {pipeline_mode = #tpu.pipeline_mode<synchronous>, transform_indices = @transform_2, window_bounds = array<i64: 1, 128>}, {transform_indices = @transform_3, window_bounds = array<i64: 8, 128>}]} {
    %c0 = arith.constant 0 : index
    %c0_0 = arith.constant 0 : index
    %0 = vector.load %arg1[%c0, %c0_0] : memref<8x784xf32, #tpu.memory_space<vmem>>, vector<8x784xf32>
    %1 = arith.truncf %0 : vector<8x784xf32> to vector<8x784xbf16>
    %c0_1 = arith.constant 0 : index
    %c0_2 = arith.constant 0 : index
    %2 = vector.load %arg2[%c0_1, %c0_2] : memref<784x128xbf16, #tpu.memory_space<vmem>>, vector<784x128xbf16>
    %cst = arith.constant dense<0.000000e+00> : vector<8x128xf32>
    %3 = tpu.matmul %1, %2, %cst {dimension_numbers = #tpu.dot_dimension_numbers<[1], [0], [0], [1], [0, 0, 1, 1], [], []>} : vector<8x784xbf16>, vector<784x128xbf16>, vector<8x128xf32> -> vector<8x128xf32>
    %c0_3 = arith.constant 0 : index
    %c0_4 = arith.constant 0 : index
    %4 = vector.load %arg3[%c0_3, %c0_4] : memref<1x128xf32, #tpu.memory_space<vmem>>, vector<1x128xf32>
    %5 = vector.broadcast %4 : vector<1x128xf32> to vector<8x128xf32>
    %6 = arith.addf %3, %5 : vector<8x128xf32>
    %c0_5 = arith.constant 0 : index
    %c0_6 = arith.constant 0 : index
    %7 = vector.load %arg4[%c0_5, %c0_6] : memref<8x128xf32, #tpu.memory_space<vmem>>, vector<8x128xf32>
    tpu.vector_store %arg4[%c0_5, %c0_6], %6 {strides = array<i32>} : memref<8x128xf32, #tpu.memory_space<vmem>>, vector<8x128xf32>,
    return
  }
  func.func @transform_0(%arg0: i32) -> (i32, i32) {
    %c0_i32 = arith.constant 0 : i32
    %c0_i32_0 = arith.constant 0 : i32
    return %arg0, %c0_i32 : i32, i32
  }
  func.func @transform_1(%arg0: i32) -> (i32, i32) {
    %c0_i32 = arith.constant 0 : i32
    %c0_i32_0 = arith.constant 0 : i32
    %c0_i32_1 = arith.constant 0 : i32
    return %c0_i32, %c0_i32_0 : i32, i32
  }
  func.func @transform_2(%arg0: i32) -> (i32, i32) {
    %c0_i32 = arith.constant 0 : i32
    %c0_i32_0 = arith.constant 0 : i32
    %c0_i32_1 = arith.constant 0 : i32
    return %c0_i32, %c0_i32_0 : i32, i32
  }
  func.func @transform_3(%arg0: i32) -> (i32, i32) {
    %c0_i32 = arith.constant 0 : i32
    %c0_i32_0 = arith.constant 0 : i32
    return %arg0, %c0_i32 : i32, i32
  }
}

</mosaic_0001>

<bundles_post_ra>
// kernel: network_forward.1
= control target key start
LH: loop header
LB: loop body
LE: loop exit
PB: predicated region body
PF: predicated region fallthrough
CT: control target
= control target key end

     0   :  { %v809_v44 = vmov 0.0   ;;  %vm810_vm0 = vmmov 0   ;;  %s1015_s0 = inlined_call_operand.vmem [shape: f32[8,784], index: 0, kind: input, shape index: {}]   ;;  %s1016_s1 = inlined_call_operand.vmem [shape: bf16[784,128], index: 1, kind: input, shape index: {}]   ;;  %s1017_s2 = inlined_call_operand.vmem [shape: f32[1,128], index: 2, kind: input, shape index: {}]   ;;  %s1018_s3 = inlined_call_operand.hbm [shape: f32[8,128], index: 3, kind: output, shape index: {}]  }
   0x1   :  { %v736_v0 = vld [vmem:[%s1016_s1 + $0x40] sm:$0xff]   ;;  %v740_v4 = vld [vmem:[%s1016_s1 + $0x48] sm:$0xff]   ;;  %v744_v8 = vld [vmem:[%s1016_s1 + $0x50] sm:$0xff]  }
   0x2   :  { %v737_v1 = vld [vmem:[%s1016_s1] sm:$0xff]   ;;  %659 = vmatprep.subr.bf16.mxu0 %v736_v0  ;;  %v741_v5 = vld [vmem:[%s1016_s1 + $0x8] sm:$0xff]   ;;  %v745_v9 = vld [vmem:[%s1016_s1 + $0x10] sm:$0xff]  }
   0x3   :  { %v738_v2 = vld [vmem:[%s1016_s1 + $0xc0] sm:$0xff]   ;;  %660 = vmatpush3.bf16.msra.mxu0 %v737_v1  ;;  %v742_v6 = vld [vmem:[%s1016_s1 + $0xc8] sm:$0xff]   ;;  %v746_v10 = vld [vmem:[%s1016_s1 + $0xd0] sm:$0xff]  }
   0x4   :  { %v739_v3 = vld [vmem:[%s1016_s1 + $0x80] sm:$0xff]   ;;  %681 = vmatprep.subr.bf16.mxu1 %v738_v2  ;;  %661 = vmatprep.subr.bf16.mxu0 %v740_v4  ;;  %v743_v7 = vld [vmem:[%s1016_s1 + $0x88] sm:$0xff]   ;;  %v747_v11 = vld [vmem:[%s1016_s1 + $0x90] sm:$0xff]  }
   0x5   :  { %682 = vmatpush3.bf16.msra.mxu1 %v739_v3  ;;  %v748_v12 = vld [vmem:[%s1016_s1 + $0x58] sm:$0xff]   ;;  %v752_v16 = vld [vmem:[%s1016_s1 + $0x60] sm:$0xff]   ;;  %v756_v20 = vld [vmem:[%s1016_s1 + $0x68] sm:$0xff]  }
   0x6   :  { %683 = vmatprep.subr.bf16.mxu1 %v742_v6  ;;  %v749_v13 = vld [vmem:[%s1016_s1 + $0x18] sm:$0xff]   ;;  %v753_v17 = vld [vmem:[%s1016_s1 + $0x20] sm:$0xff]   ;;  %v757_v21 = vld [vmem:[%s1016_s1 + $0x28] sm:$0xff]  }
   0x7   :  { %662 = vmatpush3.bf16.msra.mxu0 %v741_v5  ;;  %v750_v14 = vld [vmem:[%s1016_s1 + $0xd8] sm:$0xff]   ;;  %v754_v18 = vld [vmem:[%s1016_s1 + $0xe0] sm:$0xff]   ;;  %v758_v22 = vld [vmem:[%s1016_s1 + $0xe8] sm:$0xff]  }
   0x8   :  { %663 = vmatprep.subr.bf16.mxu0 %v744_v8  ;;  %v751_v15 = vld [vmem:[%s1016_s1 + $0x98] sm:$0xff]   ;;  %v755_v19 = vld [vmem:[%s1016_s1 + $0xa0] sm:$0xff]   ;;  %v759_v23 = vld [vmem:[%s1016_s1 + $0xa8] sm:$0xff]  }
   0x9   :  { %684 = vmatpush3.bf16.msra.mxu1 %v743_v7  ;;  %v760_v24 = vld [vmem:[%s1016_s1 + $0x70] sm:$0xff]   ;;  %v764_v28 = vld [vmem:[%s1016_s1 + $0x78] sm:$0xff]   ;;  %v17_v31 = vld [vmem:[%s1015_s0 + $0x8] sm:$0xff] }
   0xa   :  { %685 = vmatprep.subr.bf16.mxu1 %v746_v10  ;;  %v761_v25 = vld [vmem:[%s1016_s1 + $0x30] sm:$0xff]   ;;  %v765_v29 = vld [vmem:[%s1016_s1 + $0x38] sm:$0xff]   ;;  %v24_v32 = vpack.c.bf16 %v17_v31, %v17_v31  ;;  %v16_v34 = vld [vmem:[%s1015_s0] sm:$0xff] }
   0xb   :  { %664 = vmatpush3.bf16.msra.mxu0 %v745_v9  ;;  %v762_v26 = vld [vmem:[%s1016_s1 + $0xf0] sm:$0xff]   ;;  %v766_v30 = vld [vmem:[%s1016_s1 + $0xf8] sm:$0xff]   ;;  %v23_v35 = vpack.c.bf16 %v16_v34, %v16_v34  ;;  %v768_v36 = vld [vmem:[%s1016_s1 + $0x140] sm:$0xff]  }
   0xc   :  { %665 = vmatprep.subr.bf16.mxu0 %v748_v12  ;;  %v763_v27 = vld [vmem:[%s1016_s1 + $0xb0] sm:$0xff]   ;;  %v767_v33 = vld [vmem:[%s1016_s1 + $0xb8] sm:$0xff]   ;;  %465 = vmatprep.mubr.bf16.mxu0 %v24_v32  ;;  %v769_v39 = vld [vmem:[%s1016_s1 + $0x100] sm:$0xff]  }
   0xd   :  { %686 = vmatpush3.bf16.msra.mxu1 %v747_v11  ;;  %v19_v37 = vld [vmem:[%s1015_s0 + $0x18] sm:$0xff]  ;;  %v18_v40 = vld [vmem:[%s1015_s0 + $0x10] sm:$0xff]  ;;  %v770_v42 = vld [vmem:[%s1016_s1 + $0x148] sm:$0xff]  }
   0xe   :  { %687 = vmatprep.subr.bf16.mxu1 %v750_v14  ;;  %v26_v38 = vpack.c.bf16 %v19_v37, %v19_v37  ;;  %v25_v41 = vpack.c.bf16 %v18_v40, %v18_v40  ;;  %v771_v43 = vld [vmem:[%s1016_s1 + $0x108] sm:$0xff]   ;;  %v772_v45 = vld [vmem:[%s1016_s1 + $0x150] sm:$0xff]   ;;  %v774_v47 = vld [vmem:[%s1016_s1 + $0x158] sm:$0xff]  }
   0xf   :  { %666 = vmatpush3.bf16.msra.mxu0 %v749_v13  ;;  %v773_v46 = vld [vmem:[%s1016_s1 + $0x110] sm:$0xff]   ;;  %v775_v48 = vld [vmem:[%s1016_s1 + $0x118] sm:$0xff]   ;;  %v776_v49 = vld [vmem:[%s1016_s1 + $0x160] sm:$0xff]  }
  0x10   :  { %667 = vmatprep.subr.bf16.mxu0 %v752_v16  ;;  %505 = vmatprep.mubr.bf16.mxu1 %v26_v38  ;;  %v777_v50 = vld [vmem:[%s1016_s1 + $0x120] sm:$0xff]   ;;  %v778_v51 = vld [vmem:[%s1016_s1 + $0x168] sm:$0xff]   ;;  %v22_v55 = vld [vmem:[%s1015_s0 + $0x30] sm:$0xff] }
  0x11   :  { %688 = vmatpush3.bf16.msra.mxu1 %v751_v15  ;;  %v784_v52 = vld [vmem:[%s1016_s1 + $0x180] sm:$0xff]   ;;  %v21_v53 = vld [vmem:[%s1015_s0 + $0x28] sm:$0xff] }
  0x12   :  { %689 = vmatprep.subr.bf16.mxu1 %v754_v18  ;;  %v28_v54 = vpack.c.bf16 %v21_v53, %v21_v53 }
  0x13   :  { %668 = vmatpush3.bf16.msra.mxu0 %v753_v17 }
  0x14   :  { %669 = vmatprep.subr.bf16.mxu0 %v756_v20 }
  0x15   :  { %690 = vmatpush3.bf16.msra.mxu1 %v755_v19 }
  0x16   :  { %691 = vmatprep.subr.bf16.mxu1 %v758_v22 }
  0x17   :  { %670 = vmatpush3.bf16.msra.mxu0 %v757_v21 }
  0x18   :  { %671 = vmatprep.subr.bf16.mxu0 %v760_v24 }
  0x19   :  { %692 = vmatpush3.bf16.msra.mxu1 %v759_v23 }
  0x1a   :  { %693 = vmatprep.subr.bf16.mxu1 %v762_v26 }
  0x1b   :  { %672 = vmatpush3.bf16.msra.mxu0 %v761_v25 }
  0x1c   :  { %673 = vmatprep.subr.bf16.mxu0 %v764_v28 }
  0x1d   :  { %694 = vmatpush3.bf16.msra.mxu1 %v763_v27 }
  0x1e   :  { %695 = vmatprep.subr.bf16.mxu1 %v766_v30 }
  0x1f   :  { %674 = vmatpush3.bf16.msra.mxu0 %v765_v29 }
  0x20   :  { %703 = vmatprep.subr.bf16.mxu0 %v768_v36 }
  0x21   :  { %696 = vmatpush3.bf16.msra.mxu1 %v767_v33 }
  0x22   :  { %466 = vmatmul.mubr.bf16.vlgmr.msra.gmra.mrb[0].mxu0 %v23_v35  ;;  %727 = vmatprep.subr.bf16.mxu1 %v809_v44 }
  0x23   :  { %704 = vmatpush3.bf16.msra.mxu0 %v769_v39 }
  0x24   :  { %506 = vmatmul.mubr.bf16.vlgmr.msra.gmra.mrb[0].mxu1 %v25_v41  ;;  %705 = vmatprep.subr.bf16.mxu0 %v770_v42 }
  0x25   :  { %729 = vmatprep.mubr.msk.bf16.mxu1 %vm810_vm0, %v809_v44 }
  0x27   :  { %706 = vmatpush3.bf16.msra.mxu0 %v771_v43 }
  0x28   :  { %707 = vmatprep.subr.bf16.mxu0 %v772_v45 }
  0x2b   :  { %708 = vmatpush3.bf16.msra.mxu0 %v773_v46 }
  0x2c   :  { %709 = vmatprep.subr.bf16.mxu0 %v774_v47 }
  0x2f   :  { %710 = vmatpush3.bf16.msra.mxu0 %v775_v48 }
  0x30   :  { %711 = vmatprep.subr.bf16.mxu0 %v776_v49 }
  0x31   :  { %8 = vsyncpa [#allocation3], 0  ;;  %v779_v56 = vld [vmem:[%s1016_s1 + $0x128] sm:$0xff]   ;;  %728 = vmatpush3.bf16.msra.mxu1 %v784_v52  ;;  %v29_v57 = vpack.c.bf16 %v22_v55, %v22_v55  ;;  %vm429_vm1 = vcmask 130048   ;;  %v780_v58 = vld [vmem:[%s1016_s1 + $0x170] sm:$0xff]   ;;  %545 = vmatprep.mubr.bf16.mxu0 %v28_v54 }
  0x32   :  { %v781_v59 = vld [vmem:[%s1016_s1 + $0x130] sm:$0xff]   ;;  %v782_v60 = vld [vmem:[%s1016_s1 + $0x178] sm:$0xff]   ;;  %v20_v62 = vld [vmem:[%s1015_s0 + $0x20] sm:$0xff]  ;;  %s811_s0 = smov [#allocation2]  }
  0x33   :  { %712 = vmatpush3.bf16.msra.mxu0 %v777_v50  ;;  %v783_v61 = vld [vmem:[%s1016_s1 + $0x138] sm:$0xff]   ;;  %v27_v63 = vpack.c.bf16 %v20_v62, %v20_v62  ;;  %v608_v1 = vld [vmem:[%s1017_s2] ss:$0 sm:$0xff]  ;;  %s600_s1 = sshll.u32 %s811_s0, 4  ;;  %s601_s1 = int_to_ptr.vmem [resolvable:$true] %s600_s1 }
  0x34   :  { %713 = vmatprep.subr.bf16.mxu0 %v778_v51  ;;  %730 = vmatmul.mubr.msk.bf16.vlgmr.msra.gmra.mrb[4].mxu1 %vm429_vm1, %v29_v57  ;;  %s785_s2 = scalar_lea.vmem %s601_s1, 128  ;;  %p790_p1 = scmp.lt.s32.totalorder %s601_s1, %s601_s1 }
  0x35   :  { %p786_p0 = scmp.ne.s32.totalorder %s601_s1, %s785_s2  ;;  %p791_p2 = scmp.lt.s32.totalorder %s785_s2, %s785_s2 }
  0x37   :  { %714 = vmatpush3.bf16.msra.mxu0 %v779_v56  ;;  %p792_p3 = por %p791_p2, %p790_p1 }
  0x38   :  { %715 = vmatprep.subr.bf16.mxu0 %v780_v58 }
  0x39   :  { %p793_p4 = pnand %p792_p3, %p786_p0 }
  0x3b   :  { %716 = vmatpush3.bf16.msra.mxu0 %v781_v59 }
  0x3c   :  { %717 = vmatprep.subr.bf16.mxu0 %v782_v60 }
  0x3f   :  { %718 = vmatpush3.bf16.msra.mxu0 %v783_v61 }
  0x42   :  { %546 = vmatmul.mubr.bf16.vlgmr.msra.gmra.mrb[4].mxu0 %v27_v63 }
  0xf5   :  { %v675_v0 = vpop.f32.mrb[0].mxu0 }
  0xf6   :  { %v676_v2 = vpop.f32.mrb[1].mxu0 }
  0xf7   :  { %v677_v3 = vadd.f32 %v676_v2, %v675_v0  ;;  %v678_v4 = vpop.f32.mrb[2].mxu0  ;;  %v697_v5 = vpop.f32.mrb[0].mxu1 }
  0xf8   :  { %v679_v6 = vpop.f32.mrb[3].mxu0  ;;  %v698_v8 = vpop.f32.mrb[1].mxu1 }
  0xf9   :  { %v468_v7 = vadd.f32 %v677_v3, %v608_v1  ;;  %v699_v9 = vadd.f32 %v698_v8, %v697_v5  ;;  %v700_v10 = vpop.f32.mrb[2].mxu1 }
  0xfa   :  { %v701_v11 = vpop.f32.mrb[3].mxu1 }
  0xfb   :  { %v508_v12 = vadd.f32 %v699_v9, %v468_v7 }
 0x107   :  { %v587_v13 = vpop.f32.mrb[4].mxu1 }
 0x108   :  { %v731_v14 = vpop.f32.mrb[5].mxu1 }
 0x109   :  { %v590_v15 = vpop.f32.mrb[6].mxu1 }
 0x10a   :  { %v732_v16 = vpop.f32.mrb[7].mxu1 }
 0x115   :  { %v719_v17 = vpop.f32.mrb[4].mxu0 }
 0x116   :  { %v720_v18 = vpop.f32.mrb[5].mxu0 }
 0x117   :  { %v721_v19 = vadd.f32 %v720_v18, %v719_v17  ;;  %v722_v20 = vpop.f32.mrb[6].mxu0 }
 0x118   :  { %v723_v21 = vpop.f32.mrb[7].mxu0 }
 0x119   :  { %v548_v22 = vadd.f32 %v721_v19, %v508_v12 }
 0x11b   :  { %v588_v23 = vadd.f32 %v587_v13, %v548_v22 }
 0x11d   :  { %593 = vst [vmem:[#allocation2] sm:$0xff] %v588_v23 }
 0x11e   :  { %796 = shalt.err (!%p793_p4)
}
 0x11f   :  { %s797_s20 = scalar_lea.hbm %s1018_s3, 128 }
 0x120   :  { %p798_p5 = scmp.ne.s32.totalorder %s1018_s3, %s797_s20  ;;  %p801_p6 = scmp.lt.u32.totalorder %s797_s20, %s1018_s3 }
 0x122   :  { %p803_p7 = pnand %p801_p6, %p798_p5 }
 0x124   :  { %806 = shalt.err (!%p803_p7)
}
 0x125   :  { %603 = dma.vmem_to_hbm [thread:$0]  %s601_s1, 128, %s1018_s3, [#allocation3]  }
 0x126   :  { %807 = dma.done.wait [#allocation3], 128  }
 0x127   :  { %808 = vsyncadd [#allocation3], 4294967168 }
 0x128   :  { %607 = vsyncpa [#allocation3], 1 }

</bundles_post_ra>
